<compile_context>
chip_gen: v7x
topology: tpu7x:2x2x1
jax: 0.10.0
libtpu: 0.0.40
codegen_flags: <defaults>
</compile_context>

<pallas_src>
import jax
import jax.numpy as jnp
from jax.experimental import pallas as pl
from jax.experimental.pallas import tpu as pltpu


def _identity_copy_kernel(x_ref, o_ref):
    # Pass-through of one tile of the representation-layer output.
    o_ref[...] = x_ref[...]


# Tile-size policy (per perf review):
#   * bounded row tile (<= 512 rows) so the BlockSpec pipeline overlaps the
#     read-DMA of tile i+1 with the write-DMA of tile i-1, instead of one
#     unpipelined whole-array blob;
#   * tile kept small (<= ~2 MiB -> 4 live double-buffered tiles well under
#     v7x's 64 MiB physical / 32 MiB scoped VMEM, and under v5e's 16 MiB);
#   * pl.cdiv grid so a ragged last tile is handled correctly.
_MAX_TILE_ROWS = 512
_MAX_TILE_BYTES = 2 * 1024 * 1024


def _pallas_identity_copy(x):
    """Materializing identity copy of `x` via a tiled, pipelined Pallas kernel."""
    orig_shape = x.shape
    if x.ndim == 1:
        x2d = x.reshape(1, -1)
    else:
        x2d = x.reshape(-1, orig_shape[-1])
    B, H = x2d.shape

    # Lane-dense output is the dominant in-kernel lever for a pure copy:
    # if the last dim is not a multiple of 128 but the total size is,
    # present a [N/128, 128] view so stores are unmasked full-lane `vst`.
    if H % 128 != 0 and (B * H) % 128 == 0:
        x2d = x2d.reshape(-1, 128)
        B, H = x2d.shape

    itemsize = jnp.dtype(x2d.dtype).itemsize
    row_bytes = max(H * itemsize, 1)
    tb = min(B, _MAX_TILE_ROWS, max(8, _MAX_TILE_BYTES // row_bytes))
    if tb < B:
        # Second-to-last block dim must be a multiple of 8 (f32 sublanes)
        # unless it equals the full array dim.
        tb = max(8, (tb // 8) * 8)

    grid = (pl.cdiv(B, tb),)  # cdiv: never silently drop trailing rows

    out2d = pl.pallas_call(
        _identity_copy_kernel,
        out_shape=jax.ShapeDtypeStruct((B, H), x2d.dtype),
        grid=grid,
        in_specs=[pl.BlockSpec((tb, H), lambda i: (i, 0))],
        out_specs=pl.BlockSpec((tb, H), lambda i: (i, 0)),
        compiler_params=pltpu.CompilerParams(
            dimension_semantics=("parallel",),
        ),
    )(x2d)
    return out2d.reshape(orig_shape)


def base_task_forward(logits, label_inputs=None, *, materialize=False):
    """Pallas 'forward' for BaseTask: returns logits unchanged.

    BaseTask defines no loss / task-head compute, so the identity is the only
    semantics.  Default path skips the kernel launch entirely (saves the full
    2*B*H*dtype HBM round trip — the #1 optimization for a no-op).  Pass
    `materialize=True` to force a fresh output buffer produced by the tiled
    Pallas copy kernel.

    `label_inputs` is accepted for signature parity but unused.
    """
    del label_inputs  # BaseTask defines no loss.
    if not materialize:
        return logits
    return _pallas_identity_copy(logits)


if __name__ == "__main__":
    key = jax.random.PRNGKey(0)
    k1, k2 = jax.random.split(key)

    # Small task-head-like logits: batch=2, hidden=32.
    logits_small = jax.random.normal(k1, (2, 32), dtype=jnp.float32)
    # Moderate lane-dense case that exercises multi-tile pipelining and the
    # ragged last tile (520 = 512 + 8 rows, hidden = 256 = 2*128 lanes).
    logits_big = jax.random.normal(k2, (520, 256), dtype=jnp.float32)

    # Default (recommended) path: no kernel launch, zero extra HBM traffic.
    out_fast = base_task_forward(logits_small, label_inputs=None)
    assert out_fast.shape == logits_small.shape
    assert jnp.array_equal(out_fast, logits_small)

    # Materializing Pallas path (small, non-lane-aligned shape).
    out_small = jax.block_until_ready(
        base_task_forward(logits_small, label_inputs=None, materialize=True)
    )
    assert out_small.shape == logits_small.shape
    assert out_small.dtype == logits_small.dtype
    assert jnp.array_equal(out_small, logits_small)

    # Materializing Pallas path (tiled, pipelined, lane-dense shape).
    out_big = jax.block_until_ready(
        base_task_forward(logits_big, label_inputs=None, materialize=True)
    )
    assert out_big.shape == logits_big.shape
    assert jnp.array_equal(out_big, logits_big)

    print("KERNEL_OK")
</pallas_src>

<mosaic_0001>
module attributes {stable_mosaic.version = 11 : i64} {
  func.func @_identity_copy_kernel(%arg0: i32, %arg1: memref<2x32xf32, #tpu.memory_space<vmem>>, %arg2: memref<2x32xf32, #tpu.memory_space<vmem>>) attributes {dimension_semantics = [#tpu.dimension_semantics<parallel>], iteration_bounds = array<i64: 1>, scalar_prefetch = 0 : i64, scratch_operands = 0 : i64, tpu.core_type = #tpu.core_type<tc>, window_params = [{transform_indices = @transform_0, window_bounds = array<i64: 2, 32>}, {transform_indices = @transform_1, window_bounds = array<i64: 2, 32>}]} {
    %c0 = arith.constant 0 : index
    %c0_0 = arith.constant 0 : index
    %0 = vector.load %arg1[%c0, %c0_0] : memref<2x32xf32, #tpu.memory_space<vmem>>, vector<2x32xf32>
    %c0_1 = arith.constant 0 : index
    %c0_2 = arith.constant 0 : index
    %1 = vector.load %arg2[%c0_1, %c0_2] : memref<2x32xf32, #tpu.memory_space<vmem>>, vector<2x32xf32>
    tpu.vector_store %arg2[%c0_1, %c0_2], %0 {strides = array<i32>} : memref<2x32xf32, #tpu.memory_space<vmem>>, vector<2x32xf32>,
    return
  }
  func.func @transform_0(%arg0: i32) -> (i32, i32) {
    %c0_i32 = arith.constant 0 : i32
    %c0_i32_0 = arith.constant 0 : i32
    return %arg0, %c0_i32 : i32, i32
  }
  func.func @transform_1(%arg0: i32) -> (i32, i32) {
    %c0_i32 = arith.constant 0 : i32
    %c0_i32_0 = arith.constant 0 : i32
    return %arg0, %c0_i32 : i32, i32
  }
}

</mosaic_0001>

<bundles_post_ra>
// kernel: tpu_custom_call.1
= control target key start
LH: loop header
LB: loop body
LE: loop exit
PB: predicated region body
PF: predicated region fallthrough
CT: control target
= control target key end

     0   :  { %6 = vsyncpa [#allocation3], 0  ;;  %s125_s0 = inlined_call_operand.hbm [shape: f32[2,32], index: 0, kind: input, shape index: {}]   ;;  %s126_s1 = inlined_call_operand.hbm [shape: f32[2,32], index: 1, kind: output, shape index: {}]  }
   0x1   :  { %7 = vsyncpa [#allocation4], 0  ;;  %s89_s6 = smov [#allocation2]   ;;  %s41_s10 = scalar_lea.hbm %s125_s0, 32 }
   0x2   :  { %s14_s7 = sshll.u32 %s89_s6, 4  ;;  %p42_p0 = scmp.ne.s32.totalorder %s125_s0, %s41_s10  ;;  %s15_s7 = int_to_ptr.vmem [resolvable:$true] %s14_s7 }
   0x3   :  { %p45_p1 = scmp.lt.u32.totalorder %s41_s10, %s125_s0 }
   0x5   :  { %p47_p2 = pnand %p45_p1, %p42_p0 }
   0x7   :  { %50 = shalt.err (!%p47_p2)
}
   0x8   :  { %s51_s15 = scalar_lea.vmem %s15_s7, 32  ;;  %p56_p4 = scmp.lt.s32.totalorder %s15_s7, %s15_s7 }
   0x9   :  { %p52_p3 = scmp.ne.s32.totalorder %s15_s7, %s51_s15  ;;  %p57_p5 = scmp.lt.s32.totalorder %s51_s15, %s51_s15 }
   0xb   :  { %p58_p6 = por %p57_p5, %p56_p4 }
   0xd   :  { %p59_p7 = pnand %p58_p6, %p52_p3 }
   0xf   :  { %62 = shalt.err (!%p59_p7)
}
  0x10   :  { %17 = dma.hbm_to_vmem [thread:$0]  %s125_s0, 32, %s15_s7, [#allocation3]  }
  0x11   :  { %85 = dma.done.wait [#allocation3], 32  }
  0x12   :  { %86 = vsyncadd [#allocation3], 4294967264  ;;  %s90_s18 = smov [#allocation5]   ;;  %vm22_vm0 = vcmask 254976   ;;  %v21_v0 = vld [vmem:[#allocation2] sm:$0x3] }
  0x13   :  { %s30_s19 = sshll.u32 %s90_s18, 4  ;;  %23 = vst.msk [vmem:[#allocation5] sm:$0x3] %vm22_vm0, %v21_v0  ;;  %s31_s19 = int_to_ptr.vmem [resolvable:$true] %s30_s19 }
  0x14   :  { %s63_s20 = scalar_lea.vmem %s31_s19, 32  ;;  %p68_p9 = scmp.lt.s32.totalorder %s31_s19, %s31_s19 }
  0x15   :  { %p64_p8 = scmp.ne.s32.totalorder %s31_s19, %s63_s20  ;;  %p69_p10 = scmp.lt.s32.totalorder %s63_s20, %s63_s20 }
  0x17   :  { %p70_p11 = por %p69_p10, %p68_p9 }
  0x19   :  { %p71_p12 = pnand %p70_p11, %p64_p8 }
  0x1b   :  { %74 = shalt.err (!%p71_p12)
}
  0x1c   :  { %s75_s23 = scalar_lea.hbm %s126_s1, 32 }
  0x1d   :  { %p76_p13 = scmp.ne.s32.totalorder %s126_s1, %s75_s23  ;;  %p79_p0 = scmp.lt.u32.totalorder %s75_s23, %s126_s1 }
  0x1f   :  { %p81_p1 = pnand %p79_p0, %p76_p13 }
  0x21   :  { %84 = shalt.err (!%p81_p1)
}
  0x22   :  { %33 = dma.vmem_to_hbm [thread:$0]  %s31_s19, 32, %s126_s1, [#allocation4]  }
  0x23   :  { %87 = dma.done.wait [#allocation4], 32  }
  0x24   :  { %88 = vsyncadd [#allocation4], 4294967264 }
  0x25   :  { %37 = vsyncpa [#allocation3], 1 }
  0x26   :  { %38 = vsyncpa [#allocation4], 1 }

</bundles_post_ra>
